<compile_context>
chip_gen: v5e
topology: v5e:2x2
jax: 0.10.0
libtpu: 0.0.40
codegen_flags: <defaults>
</compile_context>

<pallas_src>
import functools

import jax
import jax.numpy as jnp
from jax.experimental import pallas as pl
from jax.experimental.pallas import tpu as pltpu

_SUBLANE = 8


def _round_up(x, m):
    return ((x + m - 1) // m) * m


def _dqn_kernel(x_ref, w1_ref, b1_ref, w2_ref, b2_ref, w3_ref, b3_ref, o_ref):
    # One (TB, n_obs) batch tile per grid step; weights are resident across the
    # whole grid. Three MXU matmuls fused with bias + ReLU on the VPU, all
    # accumulating in f32 regardless of weight dtype.
    x = x_ref[...]

    h1 = jnp.dot(x.astype(w1_ref.dtype), w1_ref[...],
                 preferred_element_type=jnp.float32)
    h1 = jnp.maximum(h1 + b1_ref[...].astype(jnp.float32), 0.0)

    h2 = jnp.dot(h1.astype(w2_ref.dtype), w2_ref[...],
                 preferred_element_type=jnp.float32)
    h2 = jnp.maximum(h2 + b2_ref[...].astype(jnp.float32), 0.0)

    out = jnp.dot(h2.astype(w3_ref.dtype), w3_ref[...],
                  preferred_element_type=jnp.float32)
    out = out + b3_ref[...].astype(jnp.float32)
    o_ref[...] = out.astype(o_ref.dtype)


@functools.partial(jax.jit, static_argnames=("block_b",))
def dqn_forward(x, params, *, block_b=1024):
    """Fused DQN forward: relu(x@W1+b1) -> relu(.@W2+b2) -> .@W3+b3.

    x: (B, n_observations) float32.
    params: (w1, b1, w2, b2, w3, b3); weights (in, out), biases (1, out).
            Weights/biases may be float32 or bfloat16 (f32 accumulation either way).
    """
    w1, b1, w2, b2, w3, b3 = params
    B, n_obs = x.shape
    hidden = w1.shape[1]
    n_actions = w3.shape[1]

    # --- Even batch tiling (minimizes padded rows) ------------------------
    num_tiles = pl.cdiv(B, block_b)
    # v7x megacore: at training-size batches guarantee >= 2 tiles so both
    # TensorCores engage; tiny batches stay single-tile (overhead would dominate).
    if B > 512 and num_tiles < 2:
        num_tiles = 2
    tb = _round_up(pl.cdiv(B, num_tiles), _SUBLANE)   # always a multiple of 8
    b_pad = num_tiles * tb
    if b_pad != B:
        x = jnp.pad(x, ((0, b_pad - B), (0, 0)))
    grid = (num_tiles,)

    const = lambda shape: pl.BlockSpec(shape, lambda i: (0, 0))

    # Real traffic (lane-dense-free output: only n_actions columns are written).
    bytes_accessed = (
        b_pad * n_obs * x.dtype.itemsize
        + sum(a.size * a.dtype.itemsize for a in (w1, b1, w2, b2, w3, b3))
        + b_pad * n_actions * 4
    )
    cost = pl.CostEstimate(
        flops=2 * b_pad * (n_obs * hidden + hidden * hidden + hidden * n_actions),
        transcendentals=0,
        bytes_accessed=bytes_accessed,
    )

    out = pl.pallas_call(
        _dqn_kernel,
        out_shape=jax.ShapeDtypeStruct((b_pad, n_actions), jnp.float32),
        grid=grid,
        in_specs=[
            pl.BlockSpec((tb, n_obs), lambda i: (i, 0)),   # x: batch-tiled
            const(w1.shape), const(b1.shape),              # weights: resident
            const(w2.shape), const(b2.shape),
            const(w3.shape), const(b3.shape),
        ],
        # Output block last dim == full array dim (n_actions), so no 128-lane
        # padding and no wrapper column slice; only batch padding is trimmed.
        out_specs=pl.BlockSpec((tb, n_actions), lambda i: (i, 0)),
        compiler_params=pltpu.CompilerParams(
            dimension_semantics=("parallel",),             # megacore on v7x
        ),
        cost_estimate=cost,
    )(x, w1, b1, w2, b2, w3, b3)

    if b_pad != B:
        out = out[:B]
    return out


def init_dqn_params(key, n_observations, n_actions, hidden=128,
                    dtype=jnp.bfloat16):
    """Init mimicking PyTorch nn.Linear default (uniform +-1/sqrt(fan_in)).
    Weights are stored (in_features, out_features); biases (1, out_features).
    Default dtype is bf16 (halves resident weight DMA; MXU accumulates in f32)."""
    keys = jax.random.split(key, 6)

    def linear(kw, kb, fan_in, fan_out):
        bound = 1.0 / jnp.sqrt(jnp.float32(fan_in))
        w = jax.random.uniform(kw, (fan_in, fan_out), jnp.float32, -bound, bound)
        b = jax.random.uniform(kb, (1, fan_out), jnp.float32, -bound, bound)
        return w.astype(dtype), b.astype(dtype)

    w1, b1 = linear(keys[0], keys[1], n_observations, hidden)
    w2, b2 = linear(keys[2], keys[3], hidden, hidden)
    w3, b3 = linear(keys[4], keys[5], hidden, n_actions)
    return (w1, b1, w2, b2, w3, b3)


def dqn_reference(x, params):
    """Plain-JAX reference matching the PyTorch forward."""
    w1, b1, w2, b2, w3, b3 = (p.astype(jnp.float32) for p in params)
    h1 = jnp.maximum(x @ w1 + b1, 0.0)
    h2 = jnp.maximum(h1 @ w2 + b2, 0.0)
    return h2 @ w3 + b3


if __name__ == "__main__":
    key = jax.random.PRNGKey(0)
    k_params, k_x1, k_x2 = jax.random.split(key, 3)

    n_observations = 4   # e.g. CartPole observation dim
    n_actions = 2        # e.g. CartPole action dim
    hidden = 128         # fixed by the module

    # f32 params for tight-tolerance checks.
    params_f32 = init_dqn_params(k_params, n_observations, n_actions,
                                 hidden=hidden, dtype=jnp.float32)

    # Small batch (single grid tile) — acting path.
    x_small = jax.random.normal(k_x1, (8, n_observations), jnp.float32)
    out_small = jax.block_until_ready(dqn_forward(x_small, params_f32))
    ref_small = dqn_reference(x_small, params_f32)
    assert out_small.shape == (8, n_actions)
    assert jnp.allclose(out_small, ref_small, atol=1e-5, rtol=1e-5)

    # Non-multiple batch with a small block_b: exercises the even-tiling path
    # (num_tiles=3, tb=104, b_pad=312 instead of padding to 384/512).
    x_big = jax.random.normal(k_x2, (300, n_observations), jnp.float32)
    out_big = jax.block_until_ready(dqn_forward(x_big, params_f32, block_b=128))
    ref_big = dqn_reference(x_big, params_f32)
    assert out_big.shape == (300, n_actions)
    assert jnp.allclose(out_big, ref_big, atol=1e-5, rtol=1e-5)

    # Default (bf16) params: halves weight DMA; MXU still accumulates in f32.
    params_bf16 = init_dqn_params(k_params, n_observations, n_actions,
                                  hidden=hidden)
    out_bf16 = jax.block_until_ready(dqn_forward(x_big, params_bf16))
    ref_bf16 = dqn_reference(x_big, params_bf16)
    assert out_bf16.shape == (300, n_actions)
    assert jnp.allclose(out_bf16, ref_bf16, atol=5e-2, rtol=5e-2)

    print("KERNEL_OK")
</pallas_src>

<mosaic_0001>
module attributes {stable_mosaic.version = 11 : i64} {
  func.func @_dqn_kernel(%arg0: i32, %arg1: memref<8x4xf32, #tpu.memory_space<vmem>>, %arg2: memref<4x128xf32, #tpu.memory_space<vmem>>, %arg3: memref<1x128xf32, #tpu.memory_space<vmem>>, %arg4: memref<128x128xf32, #tpu.memory_space<vmem>>, %arg5: memref<1x128xf32, #tpu.memory_space<vmem>>, %arg6: memref<128x2xf32, #tpu.memory_space<vmem>>, %arg7: memref<1x2xf32, #tpu.memory_space<vmem>>, %arg8: memref<8x2xf32, #tpu.memory_space<vmem>>) attributes {dimension_semantics = [#tpu.dimension_semantics<parallel>], iteration_bounds = array<i64: 1>, scalar_prefetch = 0 : i64, scratch_operands = 0 : i64, tpu.core_type = #tpu.core_type<tc>, window_params = [{transform_indices = @transform_0, window_bounds = array<i64: 8, 4>}, {pipeline_mode = #tpu.pipeline_mode<synchronous>, transform_indices = @transform_1, window_bounds = array<i64: 4, 128>}, {pipeline_mode = #tpu.pipeline_mode<synchronous>, transform_indices = @transform_2, window_bounds = array<i64: 1, 128>}, {pipeline_mode = #tpu.pipeline_mode<synchronous>, transform_indices = @transform_3, window_bounds = array<i64: 128, 128>}, {pipeline_mode = #tpu.pipeline_mode<synchronous>, transform_indices = @transform_4, window_bounds = array<i64: 1, 128>}, {pipeline_mode = #tpu.pipeline_mode<synchronous>, transform_indices = @transform_5, window_bounds = array<i64: 128, 2>}, {pipeline_mode = #tpu.pipeline_mode<synchronous>, transform_indices = @transform_6, window_bounds = array<i64: 1, 2>}, {transform_indices = @transform_7, window_bounds = array<i64: 8, 2>}]} {
    %c0 = arith.constant 0 : index
    %c0_0 = arith.constant 0 : index
    %0 = vector.load %arg1[%c0, %c0_0] : memref<8x4xf32, #tpu.memory_space<vmem>>, vector<8x4xf32>
    %c0_1 = arith.constant 0 : index
    %c0_2 = arith.constant 0 : index
    %1 = vector.load %arg2[%c0_1, %c0_2] : memref<4x128xf32, #tpu.memory_space<vmem>>, vector<4x128xf32>
    %cst = arith.constant dense<0.000000e+00> : vector<8x128xf32>
    %2 = tpu.matmul %0, %1, %cst {dimension_numbers = #tpu.dot_dimension_numbers<[1], [0], [0], [1], [0, 0, 1, 1], [], []>} : vector<8x4xf32>, vector<4x128xf32>, vector<8x128xf32> -> vector<8x128xf32>
    %c0_3 = arith.constant 0 : index
    %c0_4 = arith.constant 0 : index
    %3 = vector.load %arg3[%c0_3, %c0_4] : memref<1x128xf32, #tpu.memory_space<vmem>>, vector<1x128xf32>
    %4 = vector.broadcast %3 : vector<1x128xf32> to vector<8x128xf32>
    %5 = arith.addf %2, %4 : vector<8x128xf32>
    %cst_5 = arith.constant 0.000000e+00 : f32
    %6 = vector.broadcast %cst_5 : f32 to vector<8x128xf32>
    %7 = arith.maximumf %5, %6 : vector<8x128xf32>
    %c0_6 = arith.constant 0 : index
    %c0_7 = arith.constant 0 : index
    %8 = vector.load %arg4[%c0_6, %c0_7] : memref<128x128xf32, #tpu.memory_space<vmem>>, vector<128x128xf32>
    %cst_8 = arith.constant dense<0.000000e+00> : vector<8x128xf32>
    %9 = tpu.matmul %7, %8, %cst_8 {dimension_numbers = #tpu.dot_dimension_numbers<[1], [0], [0], [1], [0, 0, 1, 1], [], []>} : vector<8x128xf32>, vector<128x128xf32>, vector<8x128xf32> -> vector<8x128xf32>
    %c0_9 = arith.constant 0 : index
    %c0_10 = arith.constant 0 : index
    %10 = vector.load %arg5[%c0_9, %c0_10] : memref<1x128xf32, #tpu.memory_space<vmem>>, vector<1x128xf32>
    %11 = vector.broadcast %10 : vector<1x128xf32> to vector<8x128xf32>
    %12 = arith.addf %9, %11 : vector<8x128xf32>
    %cst_11 = arith.constant 0.000000e+00 : f32
    %13 = vector.broadcast %cst_11 : f32 to vector<8x128xf32>
    %14 = arith.maximumf %12, %13 : vector<8x128xf32>
    %c0_12 = arith.constant 0 : index
    %c0_13 = arith.constant 0 : index
    %15 = vector.load %arg6[%c0_12, %c0_13] : memref<128x2xf32, #tpu.memory_space<vmem>>, vector<128x2xf32>
    %cst_14 = arith.constant dense<0.000000e+00> : vector<8x2xf32>
    %16 = tpu.matmul %14, %15, %cst_14 {dimension_numbers = #tpu.dot_dimension_numbers<[1], [0], [0], [1], [0, 0, 1, 1], [], []>} : vector<8x128xf32>, vector<128x2xf32>, vector<8x2xf32> -> vector<8x2xf32>
    %c0_15 = arith.constant 0 : index
    %c0_16 = arith.constant 0 : index
    %17 = vector.load %arg7[%c0_15, %c0_16] : memref<1x2xf32, #tpu.memory_space<vmem>>, vector<1x2xf32>
    %18 = vector.broadcast %17 : vector<1x2xf32> to vector<8x2xf32>
    %19 = arith.addf %16, %18 : vector<8x2xf32>
    %c0_17 = arith.constant 0 : index
    %c0_18 = arith.constant 0 : index
    %20 = vector.load %arg8[%c0_17, %c0_18] : memref<8x2xf32, #tpu.memory_space<vmem>>, vector<8x2xf32>
    tpu.vector_store %arg8[%c0_17, %c0_18], %19 {strides = array<i32>} : memref<8x2xf32, #tpu.memory_space<vmem>>, vector<8x2xf32>,
    return
  }
  func.func @transform_0(%arg0: i32) -> (i32, i32) {
    %c0_i32 = arith.constant 0 : i32
    %c0_i32_0 = arith.constant 0 : i32
    return %arg0, %c0_i32 : i32, i32
  }
  func.func @transform_1(%arg0: i32) -> (i32, i32) {
    %c0_i32 = arith.constant 0 : i32
    %c0_i32_0 = arith.constant 0 : i32
    %c0_i32_1 = arith.constant 0 : i32
    return %c0_i32, %c0_i32_0 : i32, i32
  }
  func.func @transform_2(%arg0: i32) -> (i32, i32) {
    %c0_i32 = arith.constant 0 : i32
    %c0_i32_0 = arith.constant 0 : i32
    %c0_i32_1 = arith.constant 0 : i32
    return %c0_i32, %c0_i32_0 : i32, i32
  }
  func.func @transform_3(%arg0: i32) -> (i32, i32) {
    %c0_i32 = arith.constant 0 : i32
    %c0_i32_0 = arith.constant 0 : i32
    %c0_i32_1 = arith.constant 0 : i32
    return %c0_i32, %c0_i32_0 : i32, i32
  }
  func.func @transform_4(%arg0: i32) -> (i32, i32) {
    %c0_i32 = arith.constant 0 : i32
    %c0_i32_0 = arith.constant 0 : i32
    %c0_i32_1 = arith.constant 0 : i32
    return %c0_i32, %c0_i32_0 : i32, i32
  }
  func.func @transform_5(%arg0: i32) -> (i32, i32) {
    %c0_i32 = arith.constant 0 : i32
    %c0_i32_0 = arith.constant 0 : i32
    %c0_i32_1 = arith.constant 0 : i32
    return %c0_i32, %c0_i32_0 : i32, i32
  }
  func.func @transform_6(%arg0: i32) -> (i32, i32) {
    %c0_i32 = arith.constant 0 : i32
    %c0_i32_0 = arith.constant 0 : i32
    %c0_i32_1 = arith.constant 0 : i32
    return %c0_i32, %c0_i32_0 : i32, i32
  }
  func.func @transform_7(%arg0: i32) -> (i32, i32) {
    %c0_i32 = arith.constant 0 : i32
    %c0_i32_0 = arith.constant 0 : i32
    return %arg0, %c0_i32 : i32, i32
  }
}

</mosaic_0001>

<bundles_post_ra>
// kernel: dqn_forward.1
= control target key start
LH: loop header
LB: loop body
LE: loop exit
PB: predicated region body
PF: predicated region fallthrough
CT: control target
= control target key end

     0   :  { %vm36_vm0 = vcmask 1043456   ;;  %vm32_vm1 = vcmask 31744   ;;  %vm142_vm2 = vcmask 15360   ;;  %s307_s1 = inlined_call_operand.vmem [shape: f32[4,128], index: 1, kind: input, shape index: {}]   ;;  %s308_s0 = inlined_call_operand.vmem [shape: f32[8,4], index: 0, kind: input, shape index: {}]   ;;  %s309_s3 = inlined_call_operand.vmem [shape: f32[128,128], index: 3, kind: input, shape index: {}]   ;;  %s310_s2 = inlined_call_operand.vmem [shape: f32[1,128], index: 2, kind: input, shape index: {}]   ;;  %s311_s4 = inlined_call_operand.vmem [shape: f32[1,128], index: 4, kind: input, shape index: {}]   ;;  %s312_s5 = inlined_call_operand.vmem [shape: f32[128,2], index: 5, kind: input, shape index: {}]   ;;  %s313_s6 = inlined_call_operand.vmem [shape: f32[1,2], index: 6, kind: input, shape index: {}]   ;;  %s314_s7 = inlined_call_operand.vmem [shape: f32[8,2], index: 7, kind: output, shape index: {}]  }
   0x1   :  { %v27_v0 = vld [vmem:[%s307_s1] sm:$0xf]  ;;  %v76_v2 = vld [vmem:[%s309_s3 + $0x78] sm:$0xff]  ;;  %v75_v3 = vld [vmem:[%s309_s3 + $0x70] sm:$0xff] }
   0x2   :  { %v26_v1 = vld [vmem:[%s308_s0] sm:$0xff]  ;;  %148 = vmatpush.msk.msra.mxu0 %vm36_vm0, %v27_v0  ;;  %81 = vmatpush.msra.mxu1 %v76_v2  ;;  %v74_v4 = vld [vmem:[%s309_s3 + $0x68] sm:$0xff]  ;;  %v72_v6 = vld [vmem:[%s309_s3 + $0x58] sm:$0xff] }
   0x3   :  { %149 = vmatmul.msk.f32.vlgmr.msra.gmra.mxu0 %vm32_vm1, %v26_v1  ;;  %v73_v5 = vld [vmem:[%s309_s3 + $0x60] sm:$0xff]  ;;  %v71_v7 = vld [vmem:[%s309_s3 + $0x50] sm:$0xff]  ;;  %v70_v8 = vld [vmem:[%s309_s3 + $0x48] sm:$0xff] }
   0x4   :  { %82 = vmatpush.msra.mxu1 %v75_v3  ;;  %v69_v9 = vld [vmem:[%s309_s3 + $0x40] sm:$0xff]  ;;  %v68_v10 = vld [vmem:[%s309_s3 + $0x38] sm:$0xff]  ;;  %v67_v11 = vld [vmem:[%s309_s3 + $0x30] sm:$0xff] }
   0x5   :  { %v66_v12 = vld [vmem:[%s309_s3 + $0x28] sm:$0xff]  ;;  %v65_v13 = vld [vmem:[%s309_s3 + $0x20] sm:$0xff]  ;;  %v64_v14 = vld [vmem:[%s309_s3 + $0x18] sm:$0xff] }
   0x6   :  { %83 = vmatpush.msra.mxu1 %v74_v4  ;;  %v63_v15 = vld [vmem:[%s309_s3 + $0x10] sm:$0xff]  ;;  %v62_v16 = vld [vmem:[%s309_s3 + $0x8] sm:$0xff]  ;;  %v61_v17 = vld [vmem:[%s309_s3] sm:$0xff] }
   0x7   :  { %v117_v18 = vld [vmem:[%s312_s5 + $0x78] sm:$0xff]  ;;  %v116_v19 = vld [vmem:[%s312_s5 + $0x70] sm:$0xff]  ;;  %v115_v20 = vld [vmem:[%s312_s5 + $0x68] sm:$0xff] }
   0x8   :  { %84 = vmatpush.msra.mxu1 %v73_v5  ;;  %122 = vmatpush.msra.mxu2 %v117_v18  ;;  %v114_v21 = vld [vmem:[%s312_s5 + $0x60] sm:$0xff]  ;;  %v113_v22 = vld [vmem:[%s312_s5 + $0x58] sm:$0xff]  ;;  %v112_v23 = vld [vmem:[%s312_s5 + $0x50] sm:$0xff] }
   0x9   :  { %v111_v24 = vld [vmem:[%s312_s5 + $0x48] sm:$0xff]  ;;  %v110_v25 = vld [vmem:[%s312_s5 + $0x40] sm:$0xff]  ;;  %v109_v26 = vld [vmem:[%s312_s5 + $0x38] sm:$0xff] }
   0xa   :  { %85 = vmatpush.msra.mxu1 %v72_v6  ;;  %123 = vmatpush.msra.mxu2 %v116_v19  ;;  %v108_v27 = vld [vmem:[%s312_s5 + $0x30] sm:$0xff]  ;;  %v107_v28 = vld [vmem:[%s312_s5 + $0x28] sm:$0xff]  ;;  %v106_v29 = vld [vmem:[%s312_s5 + $0x20] sm:$0xff] }
   0xb   :  { %v105_v30 = vld [vmem:[%s312_s5 + $0x18] sm:$0xff]  ;;  %v150_v31 = vld [vmem:[%s310_s2] ss:$0 sm:$0xff]  ;;  %v104_v35 = vld [vmem:[%s312_s5 + $0x10] sm:$0xff] }
   0xc   :  { %86 = vmatpush.msra.mxu1 %v71_v7  ;;  %124 = vmatpush.msra.mxu2 %v115_v20  ;;  %v103_v36 = vld [vmem:[%s312_s5 + $0x8] sm:$0xff]  ;;  %v102_v37 = vld [vmem:[%s312_s5] sm:$0xff] }
   0xd   :  { %v151_v38 = vld [vmem:[%s311_s4] ss:$0 sm:$0xff] }
   0xe   :  { %87 = vmatpush.msra.mxu1 %v70_v8  ;;  %125 = vmatpush.msra.mxu2 %v114_v21  ;;  %v152_v42 = vld [vmem:[%s313_s6] ss:$0 sm:$0xff] }
  0x10   :  { %88 = vmatpush.msra.mxu1 %v69_v9  ;;  %126 = vmatpush.msra.mxu2 %v113_v22 }
  0x12   :  { %89 = vmatpush.msra.mxu1 %v68_v10  ;;  %127 = vmatpush.msra.mxu2 %v112_v23 }
  0x14   :  { %90 = vmatpush.msra.mxu1 %v67_v11  ;;  %128 = vmatpush.msra.mxu2 %v111_v24 }
  0x16   :  { %91 = vmatpush.msra.mxu1 %v66_v12  ;;  %129 = vmatpush.msra.mxu2 %v110_v25 }
  0x18   :  { %92 = vmatpush.msra.mxu1 %v65_v13  ;;  %130 = vmatpush.msra.mxu2 %v109_v26 }
  0x1a   :  { %93 = vmatpush.msra.mxu1 %v64_v14  ;;  %131 = vmatpush.msra.mxu2 %v108_v27 }
  0x1c   :  { %94 = vmatpush.msra.mxu1 %v63_v15  ;;  %132 = vmatpush.msra.mxu2 %v107_v28 }
  0x1e   :  { %95 = vmatpush.msra.mxu1 %v62_v16  ;;  %133 = vmatpush.msra.mxu2 %v106_v29 }
  0x20   :  { %96 = vmatpush.msra.mxu1 %v61_v17  ;;  %134 = vmatpush.msra.mxu2 %v105_v30 }
  0x22   :  { %135 = vmatpush.msra.mxu2 %v104_v35 }
  0x24   :  { %136 = vmatpush.msra.mxu2 %v103_v36 }
  0x26   :  { %137 = vmatpush.msra.mxu2 %v102_v37 }
  0x80   :  { %v57_v32 = vpop.f32.mrf.mxu0 }
  0x81   :  { %v58_v33 = vadd.f32 %v150_v31, %v57_v32 }
  0x83   :  { %v60_v34 = vmax.f32 %v58_v33, 0.0 }
  0x85   :  { %97 = vmatmul.f32.vlgmr.msra.gmra.mxu1 %v60_v34 }
 0x102   :  { %v98_v39 = vpop.f32.mrf.mxu1 }
 0x103   :  { %v99_v40 = vadd.f32 %v151_v38, %v98_v39 }
 0x105   :  { %v101_v41 = vmax.f32 %v99_v40, 0.0 }
 0x107   :  { %138 = vmatmul.f32.vlgmr.msra.gmra.mxu2 %v101_v41 }
 0x18a   :  { %v139_v43 = vpop.f32.mrf.mxu2 }
 0x18b   :  { %v140_v44 = vadd.f32 %v152_v42, %v139_v43 }
 0x18d   :  { %143 = vst.msk [vmem:[%s314_s7] sm:$0xff] %vm142_vm2, %v140_v44 }

</bundles_post_ra>
